<compile_context>
chip_gen: v6e
topology: v6e:2x2x1
jax: 0.10.0
libtpu: 0.0.40
codegen_flags: <defaults>
</compile_context>

<pallas_src>
import numpy as np

import jax
import jax.numpy as jnp
from jax import lax
from jax.experimental import pallas as pl
from jax.experimental.pallas import tpu as pltpu


def _rank_pool_kernel(x_ref, tri_ref, out_ref):
    # x_ref:   (Bb, D, T) f32 block (Bb samples)
    # tri_ref: (T, T) bf16 upper-triangular ones, VMEM-resident (constant map)
    # out_ref: (1, Bb, D) f32  -> per-sample w^T, packed per grid step
    f32 = jnp.float32
    bf16 = jnp.bfloat16

    x = x_ref[...]                                            # (Bb, D, T) f32
    Bb, D, T = x.shape
    tri = tri_ref[...]                                        # (T, T) bf16
    n = Bb * D

    # ---------------- cumsum over time: one fused hi/lo MXU pass ------------
    # x = x_hi + x_lo (bf16 split); tri is exactly 0/1 in bf16, so cum is
    # accurate to ~2^-17 relative with a single row-stacked bf16 matmul.
    x2 = x.reshape(n, T)
    x_hi = x2.astype(bf16)
    x_lo = (x2 - x_hi.astype(f32)).astype(bf16)
    xs = jnp.concatenate([x_hi, x_lo], axis=0)                # (2n, T)
    cum2 = jnp.dot(xs, tri, preferred_element_type=f32)       # (2n, T)
    cum = (cum2[:n] + cum2[n:]).reshape(Bb, D, T)             # (Bb, D, T)

    # ---------------- smooth -------------------------------------------------
    # (cum/(t+1)) / ||cum/(t+1)||  ==  cum * rsqrt(sum_d cum^2)
    sumsq = jnp.sum(cum * cum, axis=1, keepdims=True)         # (Bb, 1, T)
    s = cum * lax.rsqrt(sumsq)                                # (Bb, D, T)

    # ---------------- fused Gram + S*t (single batched hi/lo dot) -----------
    # Per sample: aug = [S ; t^T] (D+1, T); G = aug aug^T = [[A, m4],[m4^T,.]].
    # stacked = [s_hi ; t ; s_lo ; 0] (2(D+1), T); t row is exact in bf16, so
    # its lo part is 0.  One batched dot gives all hi/lo cross blocks.
    lane_t = lax.broadcasted_iota(jnp.int32, (1, 1, T), 2)
    t_rows = jnp.broadcast_to((lane_t + 1).astype(bf16), (Bb, 1, T))
    z_rows = jnp.zeros((Bb, 1, T), bf16)
    s_hi = s.astype(bf16)
    s_lo = (s - s_hi.astype(f32)).astype(bf16)
    stacked = jnp.concatenate([s_hi, t_rows, s_lo, z_rows], axis=1)  # (Bb, 2(D+1), T)

    dims = (((2,), (2,)), ((0,), (0,)))                       # contract T, batch Bb
    HH = lax.dot_general(stacked, stacked, dims,
                         preferred_element_type=f32)          # (Bb, 2(D+1), 2(D+1))
    Dp = D + 1
    G = HH[:, :Dp, :Dp] + HH[:, :Dp, Dp:] + HH[:, Dp:, :Dp]   # hi.hi + hi.lo + lo.hi
    N = G[:, :, :D]                                           # (Bb, D+1, D) = [A ; m4^T]

    # ---------------- solve A w = m4 (batched column Gauss-Jordan) ----------
    # Column ops (right-multiply by A^{-1}) reduce N to [I ; w^T]; A = S S^T is
    # SPD for generic inputs, so diagonal pivots are safe (matches .inverse()).
    # Fully unrolled: D is small and static; all slices are static.
    cidx = lax.broadcasted_iota(jnp.int32, (1, 1, D), 2)
    for k in range(D):
        piv = N[:, k:k + 1, k:k + 1]                          # (Bb, 1, 1)
        colk = N[:, :, k:k + 1] / piv                         # (Bb, D+1, 1)
        rowk = N[:, k:k + 1, :]                               # (Bb, 1, D)
        elim = jnp.where(cidx == k, 0.0, rowk)                # zero pivot col
        N = N - colk * elim                                   # rank-1 update
        N = jnp.where(cidx == k, colk, N)                     # set column k

    out_ref[0] = N[:, D, :]                                   # (Bb, D) = w^T per sample


def _pick_batch_block(B, D, row_target=256):
    """Bb samples per grid step so Bb*D ~ row_target MXU rows, >=2 steps if B>=2."""
    Bb = max(1, min(B, max(1, row_target // max(D, 1))))
    steps = pl.cdiv(B, Bb)
    if steps < 2 and B >= 2:
        Bb = pl.cdiv(B, 2)
        steps = pl.cdiv(B, Bb)
    return Bb, steps


def _vmem_limit_bytes(Bb, D, T):
    """Derive the scoped-VMEM limit from the actual chip (no hard 32 MiB cap)."""
    try:
        cap = int(getattr(pltpu.get_tpu_info(), "vmem_capacity_bytes", 0)) or (64 << 20)
    except Exception:
        cap = 64 << 20                                        # conservative (v7x)
    est = (2 * Bb * D * T * 4                                 # x block, double-buffered
           + 2 * T * T * 2                                    # resident tri (2 bufs, conservative)
           + 2 * Bb * D * 4                                   # output block
           + 10 * Bb * (D + 2) * T * 4                        # cum / s / hi-lo temporaries
           + 6 * Bb * (2 * D + 2) * (2 * D + 2) * 4)          # HH / G / solve temporaries
    limit = max(est, 32 << 20)
    limit = min(limit, int(0.75 * cap))
    return max(limit, 4 << 20)


def rank_pooling(x):
    """x: (B, D, T) float32 -> (B, 2D, 1) float32 (same as the torch module)."""
    B, D, T = x.shape
    x = x.astype(jnp.float32)

    Bb, num_steps = _pick_batch_block(B, D)
    Bpad = num_steps * Bb
    if Bpad > B:
        # Edge-pad with the last real sample: padded systems stay non-singular
        # (and NaN-free); their outputs are dropped below.
        pad = jnp.broadcast_to(x[B - 1:B], (Bpad - B, D, T))
        x = jnp.concatenate([x, pad], axis=0)

    # Upper-triangular ones (tri[s, t] = 1 for s <= t): cumsum-as-matmul
    # operand, exact in bf16, built once; constant index_map keeps it resident.
    tri = jnp.triu(jnp.ones((T, T), jnp.float32)).astype(jnp.bfloat16)

    w = pl.pallas_call(
        _rank_pool_kernel,
        out_shape=jax.ShapeDtypeStruct((num_steps, Bb, D), jnp.float32),
        grid_spec=pltpu.PrefetchScalarGridSpec(
            num_scalar_prefetch=0,
            grid=(num_steps,),
            in_specs=[
                pl.BlockSpec((Bb, D, T), lambda b: (b, 0, 0)),
                pl.BlockSpec((T, T), lambda b: (0, 0)),       # VMEM-resident
            ],
            out_specs=pl.BlockSpec((1, Bb, D), lambda b: (b, 0, 0)),
        ),
        compiler_params=pltpu.CompilerParams(
            dimension_semantics=("parallel",),
            vmem_limit_bytes=_vmem_limit_bytes(Bb, D, T),
        ),
    )(x, tri)                                                 # (num_steps, Bb, D)

    w = w.reshape(Bpad, D)[:B]                                # (B, D)
    # cat((w, w), dim=0) per sample + trailing singleton dim, in the wrapper so
    # the kernel's packed output block stays dense.
    return jnp.concatenate([w, w], axis=1)[:, :, None]        # (B, 2D, 1)


def _rank_pooling_ref_np(x):
    """float64 NumPy reference mirroring the PyTorch forward exactly."""
    x = np.asarray(x, dtype=np.float64)
    B, D, T = x.shape
    cum = np.cumsum(x, axis=2)
    avg = cum / (np.arange(T, dtype=np.float64) + 1.0)
    lengths = np.sqrt(np.sum(avg * avg, axis=1, keepdims=True))
    s = avg / lengths
    t = (np.arange(T, dtype=np.float64) + 1.0)[None, :, None]    # (1, T, 1)
    m4 = s @ np.broadcast_to(t, (B, T, 1))                       # (B, D, 1)
    A = s @ np.swapaxes(s, 1, 2)                                 # (B, D, D)
    w = np.linalg.solve(A, m4)                                   # (B, D, 1)
    return np.concatenate([w, w], axis=1)                       # (B, 2D, 1)


if __name__ == "__main__":
    B, D, T = 2, 4, 16          # batch, input_dim (feature dim), frames
    key = jax.random.PRNGKey(0)
    x = jax.random.normal(key, (B, D, T), dtype=jnp.float32)

    out = rank_pooling(x)
    out = jax.block_until_ready(out)

    ref = _rank_pooling_ref_np(np.asarray(x))
    assert out.shape == (B, 2 * D, 1), out.shape
    rel_err = float(np.max(np.abs(np.asarray(out, dtype=np.float64) - ref))
                    / (np.max(np.abs(ref)) + 1e-12))
    assert rel_err < 1e-2, f"mismatch vs float64 reference: rel_err={rel_err}"
    print("KERNEL_OK")
</pallas_src>

<mosaic_0001>
module attributes {stable_mosaic.version = 11 : i64} {
  func.func @_rank_pool_kernel(%arg0: i32, %arg1: memref<1x4x16xf32, #tpu.memory_space<vmem>>, %arg2: memref<16x16xbf16, #tpu.memory_space<vmem>>, %arg3: memref<1x1x4xf32, #tpu.memory_space<vmem>>) attributes {dimension_semantics = [#tpu.dimension_semantics<parallel>], iteration_bounds = array<i64: 2>, scalar_prefetch = 0 : i64, scratch_operands = 0 : i64, tpu.core_type = #tpu.core_type<tc>, window_params = [{transform_indices = @transform_0, window_bounds = array<i64: 1, 4, 16>}, {pipeline_mode = #tpu.pipeline_mode<synchronous>, transform_indices = @transform_1, window_bounds = array<i64: 16, 16>}, {transform_indices = @transform_2, window_bounds = array<i64: 1, 1, 4>}]} {
    %c0 = arith.constant 0 : index
    %c0_0 = arith.constant 0 : index
    %c0_1 = arith.constant 0 : index
    %0 = vector.load %arg1[%c0, %c0_0, %c0_1] : memref<1x4x16xf32, #tpu.memory_space<vmem>>, vector<1x4x16xf32>
    %c0_2 = arith.constant 0 : index
    %c0_3 = arith.constant 0 : index
    %1 = vector.load %arg2[%c0_2, %c0_3] : memref<16x16xbf16, #tpu.memory_space<vmem>>, vector<16x16xbf16>
    %2 = vector.shape_cast %0 : vector<1x4x16xf32> to vector<4x16xf32>
    %3 = arith.truncf %2 : vector<4x16xf32> to vector<4x16xbf16>
    %4 = arith.extf %3 : vector<4x16xbf16> to vector<4x16xf32>
    %5 = arith.subf %2, %4 : vector<4x16xf32>
    %6 = arith.truncf %5 : vector<4x16xf32> to vector<4x16xbf16>
    %7 = tpu.concatenate %3, %6 in 0 : vector<4x16xbf16>, vector<4x16xbf16> -> vector<8x16xbf16>
    %cst = arith.constant dense<0.000000e+00> : vector<8x16xf32>
    %8 = tpu.matmul %7, %1, %cst {dimension_numbers = #tpu.dot_dimension_numbers<[1], [0], [0], [1], [0, 0, 1, 1], [], []>} : vector<8x16xbf16>, vector<16x16xbf16>, vector<8x16xf32> -> vector<8x16xf32>
    %9 = vector.extract_strided_slice %8 {offsets = [0, 0], sizes = [4, 16], strides = [1, 1]} : vector<8x16xf32> to vector<4x16xf32>
    %10 = vector.extract_strided_slice %8 {offsets = [4, 0], sizes = [4, 16], strides = [1, 1]} : vector<8x16xf32> to vector<4x16xf32>
    %11 = arith.addf %9, %10 : vector<4x16xf32>
    %12 = vector.shape_cast %11 : vector<4x16xf32> to vector<1x4x16xf32>
    %13 = arith.mulf %12, %12 : vector<1x4x16xf32>
    %cst_4 = arith.constant dense<0.000000e+00> : vector<1x16xf32>
    %14 = vector.multi_reduction <add>, %13, %cst_4 [1] : vector<1x4x16xf32> to vector<1x16xf32>
    %15 = vector.shape_cast %14 : vector<1x16xf32> to vector<1x1x16xf32>
    %16 = math.rsqrt %15 : vector<1x1x16xf32>
    %17 = vector.broadcast %16 : vector<1x1x16xf32> to vector<1x4x16xf32>
    %18 = arith.mulf %12, %17 : vector<1x4x16xf32>
    %19 = tpu.iota {dimensions = array<i32: 2>} : vector<1x1x16xi32>
    %c1_i32 = arith.constant 1 : i32
    %20 = vector.broadcast %c1_i32 : i32 to vector<1x1x16xi32>
    %21 = arith.addi %19, %20 : vector<1x1x16xi32>
    %22 = arith.sitofp %21 : vector<1x1x16xi32> to vector<1x1x16xbf16>
    %cst_5 = arith.constant 0.000000e+00 : bf16
    %23 = vector.broadcast %cst_5 : bf16 to vector<1x1x16xbf16>
    %24 = arith.truncf %18 : vector<1x4x16xf32> to vector<1x4x16xbf16>
    %25 = arith.extf %24 : vector<1x4x16xbf16> to vector<1x4x16xf32>
    %26 = arith.subf %18, %25 : vector<1x4x16xf32>
    %27 = arith.truncf %26 : vector<1x4x16xf32> to vector<1x4x16xbf16>
    %28 = tpu.concatenate %24, %22, %27, %23 in 1 : vector<1x4x16xbf16>, vector<1x1x16xbf16>, vector<1x4x16xbf16>, vector<1x1x16xbf16> -> vector<1x10x16xbf16>
    %cst_6 = arith.constant dense<0.000000e+00> : vector<1x10x10xf32>
    %29 = tpu.matmul %28, %28, %cst_6 {dimension_numbers = #tpu.dot_dimension_numbers<[2], [2], [1], [1], [0, 0, 0, 1, 1, 1], [0], [0]>} : vector<1x10x16xbf16>, vector<1x10x16xbf16>, vector<1x10x10xf32> -> vector<1x10x10xf32>
    %30 = vector.extract_strided_slice %29 {offsets = [0, 0, 0], sizes = [1, 5, 5], strides = [1, 1, 1]} : vector<1x10x10xf32> to vector<1x5x5xf32>
    %31 = vector.extract_strided_slice %29 {offsets = [0, 0, 5], sizes = [1, 5, 5], strides = [1, 1, 1]} : vector<1x10x10xf32> to vector<1x5x5xf32>
    %32 = arith.addf %30, %31 : vector<1x5x5xf32>
    %33 = vector.extract_strided_slice %29 {offsets = [0, 5, 0], sizes = [1, 5, 5], strides = [1, 1, 1]} : vector<1x10x10xf32> to vector<1x5x5xf32>
    %34 = arith.addf %32, %33 : vector<1x5x5xf32>
    %35 = vector.extract_strided_slice %34 {offsets = [0, 0, 0], sizes = [1, 5, 4], strides = [1, 1, 1]} : vector<1x5x5xf32> to vector<1x5x4xf32>
    %36 = tpu.iota {dimensions = array<i32: 2>} : vector<1x1x4xi32>
    %37 = vector.extract_strided_slice %35 {offsets = [0, 0, 0], sizes = [1, 1, 1], strides = [1, 1, 1]} : vector<1x5x4xf32> to vector<1x1x1xf32>
    %38 = vector.extract_strided_slice %35 {offsets = [0, 0, 0], sizes = [1, 5, 1], strides = [1, 1, 1]} : vector<1x5x4xf32> to vector<1x5x1xf32>
    %39 = vector.broadcast %37 : vector<1x1x1xf32> to vector<1x5x1xf32>
    %40 = arith.divf %38, %39 : vector<1x5x1xf32>
    %41 = vector.extract_strided_slice %35 {offsets = [0, 0, 0], sizes = [1, 1, 4], strides = [1, 1, 1]} : vector<1x5x4xf32> to vector<1x1x4xf32>
    %c0_i32 = arith.constant 0 : i32
    %42 = vector.broadcast %c0_i32 : i32 to vector<1x1x4xi32>
    %43 = arith.cmpi eq, %36, %42 : vector<1x1x4xi32>
    %cst_7 = arith.constant 0.000000e+00 : f32
    %44 = vector.broadcast %cst_7 : f32 to vector<1x1x4xf32>
    %45 = arith.select %43, %44, %41 : vector<1x1x4xi1>, vector<1x1x4xf32>
    %46 = vector.broadcast %40 : vector<1x5x1xf32> to vector<1x5x4xf32>
    %47 = vector.broadcast %45 : vector<1x1x4xf32> to vector<1x5x4xf32>
    %48 = arith.mulf %46, %47 : vector<1x5x4xf32>
    %49 = arith.subf %35, %48 : vector<1x5x4xf32>
    %c0_i32_8 = arith.constant 0 : i32
    %50 = vector.broadcast %c0_i32_8 : i32 to vector<1x1x4xi32>
    %51 = arith.cmpi eq, %36, %50 : vector<1x1x4xi32>
    %52 = vector.shape_cast %51 : vector<1x1x4xi1> to vector<1x1x4xi1>
    %53 = vector.broadcast %52 : vector<1x1x4xi1> to vector<1x5x4xi1>
    %54 = vector.shape_cast %40 : vector<1x5x1xf32> to vector<1x5x1xf32>
    %55 = vector.broadcast %54 : vector<1x5x1xf32> to vector<1x5x4xf32>
    %56 = arith.select %53, %55, %49 : vector<1x5x4xi1>, vector<1x5x4xf32>
    %57 = vector.extract_strided_slice %56 {offsets = [0, 1, 1], sizes = [1, 1, 1], strides = [1, 1, 1]} : vector<1x5x4xf32> to vector<1x1x1xf32>
    %58 = vector.extract_strided_slice %56 {offsets = [0, 0, 1], sizes = [1, 5, 1], strides = [1, 1, 1]} : vector<1x5x4xf32> to vector<1x5x1xf32>
    %59 = vector.broadcast %57 : vector<1x1x1xf32> to vector<1x5x1xf32>
    %60 = arith.divf %58, %59 : vector<1x5x1xf32>
    %61 = vector.extract_strided_slice %56 {offsets = [0, 1, 0], sizes = [1, 1, 4], strides = [1, 1, 1]} : vector<1x5x4xf32> to vector<1x1x4xf32>
    %c1_i32_9 = arith.constant 1 : i32
    %62 = vector.broadcast %c1_i32_9 : i32 to vector<1x1x4xi32>
    %63 = arith.cmpi eq, %36, %62 : vector<1x1x4xi32>
    %cst_10 = arith.constant 0.000000e+00 : f32
    %64 = vector.broadcast %cst_10 : f32 to vector<1x1x4xf32>
    %65 = arith.select %63, %64, %61 : vector<1x1x4xi1>, vector<1x1x4xf32>
    %66 = vector.broadcast %60 : vector<1x5x1xf32> to vector<1x5x4xf32>
    %67 = vector.broadcast %65 : vector<1x1x4xf32> to vector<1x5x4xf32>
    %68 = arith.mulf %66, %67 : vector<1x5x4xf32>
    %69 = arith.subf %56, %68 : vector<1x5x4xf32>
    %c1_i32_11 = arith.constant 1 : i32
    %70 = vector.broadcast %c1_i32_11 : i32 to vector<1x1x4xi32>
    %71 = arith.cmpi eq, %36, %70 : vector<1x1x4xi32>
    %72 = vector.shape_cast %71 : vector<1x1x4xi1> to vector<1x1x4xi1>
    %73 = vector.broadcast %72 : vector<1x1x4xi1> to vector<1x5x4xi1>
    %74 = vector.shape_cast %60 : vector<1x5x1xf32> to vector<1x5x1xf32>
    %75 = vector.broadcast %74 : vector<1x5x1xf32> to vector<1x5x4xf32>
    %76 = arith.select %73, %75, %69 : vector<1x5x4xi1>, vector<1x5x4xf32>
    %77 = vector.extract_strided_slice %76 {offsets = [0, 2, 2], sizes = [1, 1, 1], strides = [1, 1, 1]} : vector<1x5x4xf32> to vector<1x1x1xf32>
    %78 = vector.extract_strided_slice %76 {offsets = [0, 0, 2], sizes = [1, 5, 1], strides = [1, 1, 1]} : vector<1x5x4xf32> to vector<1x5x1xf32>
    %79 = vector.broadcast %77 : vector<1x1x1xf32> to vector<1x5x1xf32>
    %80 = arith.divf %78, %79 : vector<1x5x1xf32>
    %81 = vector.extract_strided_slice %76 {offsets = [0, 2, 0], sizes = [1, 1, 4], strides = [1, 1, 1]} : vector<1x5x4xf32> to vector<1x1x4xf32>
    %c2_i32 = arith.constant 2 : i32
    %82 = vector.broadcast %c2_i32 : i32 to vector<1x1x4xi32>
    %83 = arith.cmpi eq, %36, %82 : vector<1x1x4xi32>
    %cst_12 = arith.constant 0.000000e+00 : f32
    %84 = vector.broadcast %cst_12 : f32 to vector<1x1x4xf32>
    %85 = arith.select %83, %84, %81 : vector<1x1x4xi1>, vector<1x1x4xf32>
    %86 = vector.broadcast %80 : vector<1x5x1xf32> to vector<1x5x4xf32>
    %87 = vector.broadcast %85 : vector<1x1x4xf32> to vector<1x5x4xf32>
    %88 = arith.mulf %86, %87 : vector<1x5x4xf32>
    %89 = arith.subf %76, %88 : vector<1x5x4xf32>
    %c2_i32_13 = arith.constant 2 : i32
    %90 = vector.broadcast %c2_i32_13 : i32 to vector<1x1x4xi32>
    %91 = arith.cmpi eq, %36, %90 : vector<1x1x4xi32>
    %92 = vector.shape_cast %91 : vector<1x1x4xi1> to vector<1x1x4xi1>
    %93 = vector.broadcast %92 : vector<1x1x4xi1> to vector<1x5x4xi1>
    %94 = vector.shape_cast %80 : vector<1x5x1xf32> to vector<1x5x1xf32>
    %95 = vector.broadcast %94 : vector<1x5x1xf32> to vector<1x5x4xf32>
    %96 = arith.select %93, %95, %89 : vector<1x5x4xi1>, vector<1x5x4xf32>
    %97 = vector.extract_strided_slice %96 {offsets = [0, 3, 3], sizes = [1, 1, 1], strides = [1, 1, 1]} : vector<1x5x4xf32> to vector<1x1x1xf32>
    %98 = vector.extract_strided_slice %96 {offsets = [0, 0, 3], sizes = [1, 5, 1], strides = [1, 1, 1]} : vector<1x5x4xf32> to vector<1x5x1xf32>
    %99 = vector.broadcast %97 : vector<1x1x1xf32> to vector<1x5x1xf32>
    %100 = arith.divf %98, %99 : vector<1x5x1xf32>
    %101 = vector.extract_strided_slice %96 {offsets = [0, 3, 0], sizes = [1, 1, 4], strides = [1, 1, 1]} : vector<1x5x4xf32> to vector<1x1x4xf32>
    %c3_i32 = arith.constant 3 : i32
    %102 = vector.broadcast %c3_i32 : i32 to vector<1x1x4xi32>
    %103 = arith.cmpi eq, %36, %102 : vector<1x1x4xi32>
    %cst_14 = arith.constant 0.000000e+00 : f32
    %104 = vector.broadcast %cst_14 : f32 to vector<1x1x4xf32>
    %105 = arith.select %103, %104, %101 : vector<1x1x4xi1>, vector<1x1x4xf32>
    %106 = vector.broadcast %100 : vector<1x5x1xf32> to vector<1x5x4xf32>
    %107 = vector.broadcast %105 : vector<1x1x4xf32> to vector<1x5x4xf32>
    %108 = arith.mulf %106, %107 : vector<1x5x4xf32>
    %109 = arith.subf %96, %108 : vector<1x5x4xf32>
    %c3_i32_15 = arith.constant 3 : i32
    %110 = vector.broadcast %c3_i32_15 : i32 to vector<1x1x4xi32>
    %111 = arith.cmpi eq, %36, %110 : vector<1x1x4xi32>
    %112 = vector.shape_cast %111 : vector<1x1x4xi1> to vector<1x1x4xi1>
    %113 = vector.broadcast %112 : vector<1x1x4xi1> to vector<1x5x4xi1>
    %114 = vector.shape_cast %100 : vector<1x5x1xf32> to vector<1x5x1xf32>
    %115 = vector.broadcast %114 : vector<1x5x1xf32> to vector<1x5x4xf32>
    %116 = arith.select %113, %115, %109 : vector<1x5x4xi1>, vector<1x5x4xf32>
    %117 = vector.extract_strided_slice %116 {offsets = [0, 4, 0], sizes = [1, 1, 4], strides = [1, 1, 1]} : vector<1x5x4xf32> to vector<1x1x4xf32>
    %118 = vector.shape_cast %117 : vector<1x1x4xf32> to vector<1x4xf32>
    %c0_16 = arith.constant 0 : index
    %c0_17 = arith.constant 0 : index
    %c0_18 = arith.constant 0 : index
    %119 = vector.load %arg3[%c0_16, %c0_17, %c0_18] : memref<1x1x4xf32, #tpu.memory_space<vmem>>, vector<1x1x4xf32>
    %120 = vector.shape_cast %119 : vector<1x1x4xf32> to vector<1x4xf32>
    %121 = vector.shape_cast %118 : vector<1x4xf32> to vector<1x1x4xf32>
    tpu.vector_store %arg3[%c0_16, %c0_17, %c0_18], %121 {strides = array<i32>} : memref<1x1x4xf32, #tpu.memory_space<vmem>>, vector<1x1x4xf32>,
    return
  }
  func.func @transform_0(%arg0: i32) -> (i32, i32, i32) {
    %c0_i32 = arith.constant 0 : i32
    %c0_i32_0 = arith.constant 0 : i32
    %c0_i32_1 = arith.constant 0 : i32
    return %arg0, %c0_i32, %c0_i32_0 : i32, i32, i32
  }
  func.func @transform_1(%arg0: i32) -> (i32, i32) {
    %c0_i32 = arith.constant 0 : i32
    %c0_i32_0 = arith.constant 0 : i32
    %c0_i32_1 = arith.constant 0 : i32
    return %c0_i32, %c0_i32_0 : i32, i32
  }
  func.func @transform_2(%arg0: i32) -> (i32, i32, i32) {
    %c0_i32 = arith.constant 0 : i32
    %c0_i32_0 = arith.constant 0 : i32
    %c0_i32_1 = arith.constant 0 : i32
    return %arg0, %c0_i32, %c0_i32_0 : i32, i32, i32
  }
}

</mosaic_0001>

<bundles_post_ra>
// kernel: tpu_custom_call.1
= control target key start
LH: loop header
LB: loop body
LE: loop exit
PB: predicated region body
PF: predicated region fallthrough
CT: control target
= control target key end

     0   :  { %7 = vsyncpa [#allocation3], 0  ;;  %s955_s0 = inlined_call_operand.hbm [shape: f32[2,4,16], index: 0, kind: input, shape index: {}]   ;;  %s956_s1 = inlined_call_operand.hbm [shape: bf16[16,16], index: 1, kind: input, shape index: {}]   ;;  %s957_s2 = inlined_call_operand.hbm [shape: f32[2,1,4], index: 2, kind: output, shape index: {}]  }
   0x1   :  { %9 = vsyncpa [#allocation3 + $0x1], 0 }
   0x2   :  { %10 = vsyncpa [#allocation6], 0 }
   0x3   :  { %11 = vsyncpa [#allocation4], 0 }
   0x4   :  { %13 = vsyncpa [#allocation4 + $0x1], 0  ;;  %s780_s9 = smov 0   ;;  %s782_s10 = smov 0  }
   0x5   :  { %s784_s11 = smov 0   ;;  %s786_s12 = smov 0  }
   0x6 LB: > { %s801_s13 = sadd.s32 4294967295, %s751_s12   ;;  %s516_s14 = sadd.s32 4294967294, %s751_s12   ;;  %s751_s12 = sphi %s786_s12, %s979_s12   ;;  %s747_s11 = sphi %s784_s11, %s978_s11   ;;  %s743_s10 = sphi %s782_s10, %s977_s10   ;;  %s739_s9 = sphi %s780_s9, %s976_s9  }
   0x7   : > { %p39_p0 = scmp.ne.s32.totalorder %s743_s10, %s739_s9  ;;  %p958_p1 = scmp.eq.s32.totalorder %s801_s13, 0 }
   0x8   : > { %p90_p3 = scmp.eq.s32.totalorder %s516_s14, 1  ;;  %p517_p5 = scmp.ge.s32.totalorder %s751_s12, 1 }
   0x9   : > { %p810_p4 = por %p958_p1, %p39_p0  ;;  %p97_p7 = scmp.lt.s32.totalorder %s751_s12, 3 }
   0xa   : > { %p815_p6 = por %p90_p3, %p39_p0  ;;  %s753_s18 = smov [#allocation5]  }
   0xb   : > { %s962_s15 = scalar_select %p810_p4, 1, 0 }
   0xc   : > { %s963_s16 = scalar_select %p815_p6, 1, 0 }
   0xd   : > { %p820_p8 = pnand %p517_p5, %p97_p7  ;;  %s109_s19 = sshll.u32 %s753_s18, 4  ;;  %s110_s19 = int_to_ptr.vmem [resolvable:$true] %s109_s19 }
   0xe   : > { %s834_s21 = sadd.s32 1, %s751_s12   ;;  %s26_s22 = sadd.s32 1, %s747_s11 }
   0xf   : > { %s964_s17 = scalar_select %p820_p8, 1, 0 }
  0x10   : > { %p555_p9 = pneg %p820_p8  ;;  %s23_s23 = ssub.s32 %s751_s12, %s834_s21 }
  0x11   : > { %s640_s24 = scalar_lea.vmem %s110_s19, 128  ;;  %p648_p5 = scmp.lt.s32.totalorder %s110_s19, %s110_s19 }
  0x12   : > { %p829_p11 = pnand %p555_p9, %p958_p1  ;;  %p641_p13 = scmp.ne.s32.totalorder %s110_s19, %s640_s24 }
  0x13   : > { %p649_p7 = scmp.lt.s32.totalorder %s640_s24, %s640_s24 }
  0x14   : > { %p631_p12 = pneg %p829_p11 }
  0x15   : > { %p650_p10 = por %p649_p7, %p648_p5 }
  0x16   : > { %p643_p0 = pnand %p641_p13, %p631_p12 }
  0x18   : > { %p644_p3 = pneg %p643_p0 }
  0x1a   : > { %p651_p2 = pnand %p650_p10, %p644_p3 }
  0x1c   : > { %654 = shalt.err (!%p651_p2)
}
  0x1d   : > { %s754_s25 = smov 64   ;;  %s755_s26 = smov 4  }
  0x1e   : > { %558 = dma.hbm_to_vmem [thread:$0]  (!%p829_p11), %s956_s1, 128, %s110_s19, [#allocation6], %s754_s25, %s754_s25, %s755_s26  }
  0x1f   : > { %p24_p9 = scmp.eq.s32.totalorder %s23_s23, 0  ;;  %p33_p12 = scmp.ne.s32.totalorder %s747_s11, %s743_s10 }
  0x20   : > { %p34_p10 = scmp.eq.s32.totalorder %s751_s12, 0  ;;  %p568_p2 = scmp.lt.s32.totalorder %s751_s12, 2 }
  0x21   : > { %s851_s29 = scalar_select %p24_p9, %s747_s11, %s26_s22  }
  0x22   : > { %p35_p13 = por %p34_p10, %p33_p12  ;;  %p966_p0 = scmp.eq.s32.totalorder %s801_s13, 1 }
  0x23   : > { %s123_s3 = sand.u32 1, %s747_s11   ;;  %s521_s4 = sshll.u32 %s751_s12, 6 }
  0x24   : > { %p855_p3 = por %p966_p0, %p33_p12  ;;  %s520_s5 = sshll.u32 %s123_s3, 2 }
  0x25   : > { %s864_s8 = scalar_lea.hbm %s955_s0, %s521_s4  ;;  %s127_s14 = scalar_lea.vmem [#allocation2], %s520_s5 }
  0x26   : > { %s967_s30 = scalar_select %p855_p3, 1, 0 }
  0x27   : > { %s134_s18 = sshll.u32 %s127_s14, 4  ;;  %p866_p11 = pnand %p568_p2, %p35_p13  ;;  %s135_s18 = int_to_ptr.vmem [resolvable:$true] %s134_s18 }
  0x28   : > { %s124_s20 = scalar_lea.sflag [#allocation3], %s123_s3  ;;  %s655_s22 = scalar_lea.hbm %s864_s8, 64 }
  0x29   : > { %p656_p5 = scmp.ne.s32.totalorder %s864_s8, %s655_s22  ;;  %p657_p7 = pneg %p866_p11 }
  0x2a   : > { %s660_s25 = scalar_lea.hbm %s955_s0, 128  ;;  %p661_p10 = scmp.lt.s32.totalorder %s864_s8, %s955_s0 }
  0x2b   : > { %p658_p9 = pnand %p657_p7, %p656_p5  ;;  %p662_p2 = scmp.lt.s32.totalorder %s660_s25, %s655_s22 }
  0x2d   : > { %p659_p12 = pneg %p658_p9  ;;  %p663_p13 = por %p662_p2, %p661_p10 }
  0x2f   : > { %p664_p0 = pnand %p663_p13, %p659_p12 }
  0x31   : > { %667 = shalt.err (!%p664_p0)
}
  0x32   : > { %s668_s28 = scalar_lea.vmem %s135_s18, 64  ;;  %s756_s3 = smov [#allocation2]  }
  0x33   : > { %p669_p1 = scmp.ne.s32.totalorder %s135_s18, %s668_s28  ;;  %s673_s4 = sshll.u32 %s756_s3, 4  ;;  %s674_s4 = int_to_ptr.vmem [resolvable:$false] %s673_s4 }
  0x34   : > { %s675_s5 = scalar_lea.vmem %s674_s4, 128  ;;  %p676_p5 = scmp.lt.s32.totalorder %s135_s18, %s674_s4 }
  0x35   : > { %p671_p6 = pnand %p669_p1, %p657_p7  ;;  %p677_p9 = scmp.lt.s32.totalorder %s675_s5, %s668_s28 }
  0x37   : > { %p672_p3 = pneg %p671_p6  ;;  %p678_p4 = por %p677_p9, %p676_p5 }
  0x39   : > { %p679_p8 = pnand %p678_p4, %p672_p3 }
  0x3b   : > { %682 = shalt.err (!%p679_p8)
}
  0x3c   : > { %562 = dma.hbm_to_vmem [thread:$0]  (!%p866_p11), %s864_s8, 64, %s135_s18, %s124_s20  }
  0x3d   : > { %p969_p12 = scmp.ne.s32.totalorder %s964_s17, 0 }
  0x3e   : > { %s887_s6 = sand.u32 (!%p969_p12), 1, %s743_s10   ;;  %p970_p1 = scmp.ne.s32.totalorder (!%p969_p12), %s962_s15, 0 }
  0x3f   : > { %143 = sbr.rel (%p969_p12) target bundleno = 1249 (0x4e1), region = 28  ;;  %s523_s7 = sshll.u32 (!%p969_p12), %s887_s6, 2 }
  0x40   : > { %s146_s14 = scalar_lea.sflag (!%p969_p12), [#allocation3], %s887_s6  ;;  %s149_s22 = scalar_lea.vmem (!%p969_p12), [#allocation2], %s523_s7 }
  0x44   : > { %726 = dma.done.wait (%p970_p1), %s146_s14, 64  }
  0x45   : > { %728 = vsyncadd (%p970_p1), %s146_s14, 4294967232  ;;  %p971_p4 = scmp.eq.s32.totalorder %s801_s13, 0 }
  0x47   : > { %730 = dma.done.wait (%p971_p4), [#allocation6], 128   ;;  %p972_p6 = pmov %p971_p4 }
  0x48   : > { %v757_v0 = vmov 0.0   ;;  %vm758_vm0 = vmmov 0   ;;  %v618_v1 = vld [vmem:[#allocation5] sm:$0xff]   ;;  %v174_v2 = vld [vmem:[%s149_s22] sm:$0xf]  ;;  %vm183_vm1 = vcmask 1041408   ;;  %v251_v23 = vlaneseq }
  0x49   : > { %732 = vsyncadd (%p972_p6), [#allocation6], 4294967168  ;;  %535 = vmatprep.subr.bf16.mxu0 %v757_v0  ;;  %537 = vmatprep.mubr.msk.bf16.mxu0 %vm758_vm0, %v757_v0  ;;  %v177_v3 = vpack.c.bf16 %v174_v2, %v174_v2  ;;  %vm193_vm2 = vcmask 130048   ;;  %vm241_vm3 = vcmask 125952   ;;  %vm273_vm4 = vcmask 1042432   ;;  %s760_s15 = smov 123  }
  0x4a   : > { %541 = vmatprep.subr.bf16.mxu1 %v757_v0  ;;  %543 = vmatprep.mubr.msk.bf16.mxu1 %vm758_vm0, %v757_v0  ;;  %v901_v25 = vand.u32 127, %v251_v23  ;;  %vm274_vm5 = vsmask.f32 2304  ;;  %vm277_vm6 = vcmask 1044480   ;;  %vm278_vm7 = vsmask.f32 4352 }
  0x4b   : > { %536 = vmatpush3.bf16.msra.mxu0 %v618_v1  ;;  %v178_v4 = vunpack.c.l.bf16 %v177_v3  ;;  %vm275_vm8 = vmand %vm273_vm4, %vm274_vm5  ;;  %v759_v43 = vmov 0   ;;  %v338_v48 = vshrl.u32 %v251_v23, 7  ;;  %v761_v59 = vmov 1   ;;  %s528_s17 = sshll.u32 %s801_s13, 4  ;;  %s172_s8 = scalar_lea.vmem [#allocation7], %s887_s6 }
  0x4c   : > { %v253_v28 = vadd.s32 1, %v901_v25  ;;  %vm279_vm9 = vmand %vm277_vm6, %vm278_vm7  ;;  %613 = vset.pattern.permute.xlu0 %v759_v43  ;;  %614 = vset.pattern.permute.xlu1 %v761_v59  ;;  %vm343_vm10 = vcmp.eq.s32.totalorder %v901_v25, 0  ;;  %vm365_vm11 = vcmp.eq.s32.totalorder %v901_v25, 1  ;;  %vm387_vm12 = vcmp.eq.s32.totalorder %v901_v25, 2  ;;  %s440_s18 = sshll.u32 %s172_s8, 4  ;;  %s918_s23 = scalar_lea.hbm %s957_s2, %s528_s17  ;;  %s441_s18 = int_to_ptr.vmem [resolvable:$true] %s440_s18 }
  0x4d   : > { %v179_v5 = vsub.f32 %v174_v2, %v178_v4  ;;  %v339_v52 = vsub.s32 0, %v338_v48  ;;  %v361_v0 = vsub.s32 1, %v338_v48  ;;  %vm409_vm13 = vcmp.eq.s32.totalorder %v901_v25, 3  ;;  %s428_s24 = scalar_lea.sflag [#allocation4], %s887_s6  ;;  %s683_s25 = scalar_lea.vmem %s441_s18, 16 }
  0x4e   : > { %v254_v31 = vcvt.s32.f32 %v253_v28  ;;  %vm425_vm14 = vcmask 28676   ;;  %p684_p8 = scmp.ne.s32.totalorder %s441_s18, %s683_s25  ;;  %p973_p3 = scmp.ne.s32.totalorder %s967_s30, 0 }
  0x4f   : > { %v180_v6 = vpack.c.bf16 %v179_v5, %v179_v5  ;;  %s764_s26 = smov [#allocation7]  }
  0x50   : > { %v255_v35 = vpack.c.bf16 %v254_v31, %v254_v31  ;;  %p685_p11 = pnand %p684_p8, %p973_p3  ;;  %s687_s13 = sshll.u32 %s764_s26, 4  ;;  %s688_s13 = int_to_ptr.vmem [resolvable:$false] %s687_s13 }
  0x51   : > { %v182_v7 = vrot.slane %v180_v6, 6  ;;  %v762_v6 = vmov 2   ;;  %s689_s27 = scalar_lea.vmem %s688_s13, 32  ;;  %p690_p10 = scmp.lt.s32.totalorder %s441_s18, %s688_s13 }
  0x52   : > { %p686_p7 = pneg %p685_p11  ;;  %p691_p2 = scmp.lt.s32.totalorder %s689_s27, %s683_s25 }
  0x53   : > { %v186_v8 = vsel %vm183_vm1, %v177_v3, %v182_v7 }
  0x54   : > { %538 = vmatmul.mubr.msk.bf16.vlgmr.msra.gmra.mxu0 %vm193_vm2, %v186_v8  ;;  %p692_p13 = por %p691_p2, %p690_p10 }
  0x56   : > { %p693_p0 = pnand %p692_p13, %p686_p7 }
 0x114   : > { %v230_v9 = vpop.f32.mrf.mxu0 }
 0x115   : > { %v237_v10 = vrot.slane %v230_v9, 4 }
 0x116   : > { %v539_v11 = vpop.f32.mrf.mxu0 }
 0x117   : > { %v239_v12 = vadd.f32 %v237_v10, %v230_v9  ;;  %v383_v11 = vsub.s32 2, %v338_v48 }
 0x118   : > { %v233_v13 = vpop.f32.mrf.mxu0 }
 0x119   : > { %v240_v14 = vmul.f32 %v239_v12, %v239_v12 }
 0x11a   : > { %v540_v15 = vpop.f32.mrf.mxu0 }
 0x11b   : > { %v242_v16 = vsel %vm241_vm3, %v240_v14, 0.0 }
 0x11c   : > { %v243_v17 = vrot.slane %v242_v16, 4 }
 0x11e   : > { %v244_v18 = vadd.f32 %v243_v17, %v242_v16  ;;  %v763_v17 = vmov 3  }
 0x120   : > { %v245_v19 = vrot.slane %v244_v18, 2 }
 0x122   : > { %v246_v20 = vadd.f32 %v245_v19, %v244_v18 }
 0x124   : > { %v247_v21 = vrot.slane %v246_v20, 1 }
 0x126   : > { %v248_v22 = vadd.f32 %v247_v21, %v246_v20 }
 0x128   : > { %619 = vrsqrt.f32 %v248_v22  ;;  %v405_v22 = vsub.s32 3, %v338_v48 }
 0x135   : > { %v620_v24 = vpop.eup %619 }
 0x136   : > { %v250_v26 = vmul.f32 %v620_v24, %v239_v12 }
 0x138   : > { %v256_v27 = vpack.c.bf16 %v250_v26, %v250_v26 }
 0x13a   : > { %v257_v29 = vunpack.c.l.bf16 %v256_v27  ;;  %v271_v39 = vsel %vm183_vm1, %v256_v27, %v255_v35 }
 0x13c   : > { %v258_v30 = vsub.f32 %v250_v26, %v257_v29 }
 0x13e   : > { %v259_v32 = vpack.c.bf16 %v258_v30, %v258_v30 }
 0x140   : > { %v261_v33 = vshrl.u32 %v259_v32, 16  ;;  %v264_v34 = vshll.u32 %v259_v32, 16 }
 0x142   : > { %v263_v36 = vrot.slane %v261_v33, 5  ;;  %v266_v37 = vrot.slane %v264_v34, 6 }
 0x144   : > { %v267_v38 = vor.u32 %v266_v37, %v263_v36 }
 0x146   : > { %v276_v40 = vsel %vm275_vm8, %v271_v39, %v267_v38 }
 0x147   : > { %v280_v41 = vsel %vm279_vm9, %v276_v40, 0 }
 0x148   : > { %v282_v42 = vsel %vm193_vm2, %v280_v41, 0 }
 0x149   : > { %542 = vmatpush3.bf16.xpose.msra.mxu1 %v282_v42 }
 0x150   : > { %544 = vmatmul.mubr.msk.bf16.vlgmr.msra.gmra.mxu1 %vm193_vm2, %v280_v41 }
 0x210   : > { %v318_v44 = vpop.f32.mrf.mxu1 }
 0x211   : > { %326 = vrot.lane.b32.xlu0 %v318_v44, %s760_s15  ;;  %v332_v50 = vrot.slane %v318_v44, 5 }
 0x212   : > { %v545_v45 = vpop.f32.mrf.mxu1 }
 0x214   : > { %v321_v46 = vpop.f32.mrf.mxu1 }
 0x215   : > { %v333_v49 = vrot.slane %v321_v46, 5 }
 0x216   : > { %v546_v47 = vpop.f32.mrf.mxu1 }
 0x217   : > { %v334_v54 = vsel %vm273_vm4, %v332_v50, %v333_v49 }
 0x283   : > { %v327_v51 = vpop.permute.xlu0 %326 }
 0x284   : > { %v329_v53 = vadd.f32 %v327_v51, %v318_v44 }
 0x286   : > { %v336_v55 = vadd.f32 %v334_v54, %v329_v53 }
 0x288   : > { %v340_v56 = vrot.slane %v336_v55, %v339_v52  ;;  %v344_v60 = vsel %vm343_vm10, 0.0, %v336_v55 }
 0x289   : > { %v353_v61 = vrot.slane %v344_v60, %v339_v52 }
 0x28a   : > { %621 = vrcp.f32 %v340_v56 }
 0x297   : > { %v622_v57 = vpop.eup %621 }
 0x298   : > { %v342_v58 = vmul.f32 %v622_v57, %v336_v55 }
 0x29a   : > { %347 = vperm.xlu0 %613, %v342_v58  }
 0x29e   : > { %617 = vset.pattern.permute.xlu0 %v763_v17 }
 0x315   : > { %v348_v62 = vpop.permute.xlu0 %347 }
 0x316   : > { %v354_v63 = vmul.f32 %v353_v61, %v348_v62 }
 0x318   : > { %v355_v1 = vsub.f32 %v336_v55, %v354_v63 }
 0x31a   : > { %v358_v2 = vsel %vm343_vm10, %v348_v62, %v355_v1 }
 0x31b   : > { %v362_v3 = vrot.slane %v358_v2, %v361_v0  ;;  %v366_v7 = vsel %vm365_vm11, 0.0, %v358_v2 }
 0x31c   : > { %v375_v8 = vrot.slane %v366_v7, %v361_v0 }
 0x31d   : > { %623 = vrcp.f32 %v362_v3 }
 0x32a   : > { %v624_v4 = vpop.eup %623 }
 0x32b   : > { %v364_v5 = vmul.f32 %v624_v4, %v358_v2 }
 0x32d   : > { %369 = vperm.xlu1 %614, %v364_v5  }
 0x331   : > { %615 = vset.pattern.permute.xlu1 %v762_v6 }
 0x3a8   : > { %v370_v9 = vpop.permute.xlu1 %369 }
 0x3a9   : > { %v376_v10 = vmul.f32 %v375_v8, %v370_v9 }
 0x3ab   : > { %v377_v12 = vsub.f32 %v358_v2, %v376_v10 }
 0x3ad   : > { %v380_v13 = vsel %vm365_vm11, %v370_v9, %v377_v12 }
 0x3ae   : > { %v384_v14 = vrot.slane %v380_v13, %v383_v11  ;;  %v388_v18 = vsel %vm387_vm12, 0.0, %v380_v13 }
 0x3af   : > { %v397_v19 = vrot.slane %v388_v18, %v383_v11 }
 0x3b0   : > { %625 = vrcp.f32 %v384_v14 }
 0x3bd   : > { %v626_v15 = vpop.eup %625 }
 0x3be   : > { %v386_v16 = vmul.f32 %v626_v15, %v380_v13 }
 0x3c0   : > { %391 = vperm.xlu1 %615, %v386_v16  }
 0x3c4   : > { %616 = vset.pattern.permute.xlu1 %v763_v17 }
 0x43b   : > { %v392_v20 = vpop.permute.xlu1 %391 }
 0x43c   : > { %v398_v21 = vmul.f32 %v397_v19, %v392_v20 }
 0x43e   : > { %v399_v23 = vsub.f32 %v380_v13, %v398_v21 }
 0x440   : > { %v402_v24 = vsel %vm387_vm12, %v392_v20, %v399_v23 }
 0x441   : > { %v406_v26 = vrot.slane %v402_v24, %v405_v22  ;;  %v410_v29 = vsel %vm409_vm13, 0.0, %v402_v24 }
 0x442   : > { %v419_v30 = vrot.slane %v410_v29, %v405_v22 }
 0x443   : > { %627 = vrcp.f32 %v406_v26 }
 0x450   : > { %v628_v27 = vpop.eup %627 }
 0x451   : > { %v408_v28 = vmul.f32 %v628_v27, %v402_v24 }
 0x453   : > { %413 = vperm.xlu1 %616, %v408_v28  }
 0x4ce   : > { %v414_v31 = vpop.permute.xlu1 %413 }
 0x4cf   : > { %v420_v32 = vmul.f32 %v419_v30, %v414_v31 }
 0x4d1   : > { %v421_v33 = vsub.f32 %v402_v24, %v420_v32 }
 0x4d3   : > { %v424_v34 = vsel %vm409_vm13, %v414_v31, %v421_v33 }
 0x4d4   : > { %426 = vst.msk [vmem:[%s172_s8 - $0x4] sm:$0x10] %vm425_vm14, %v424_v34 }
 0x4d5   : > { %696 = shalt.err (!%p693_p0)
}
 0x4d6   : > { %s697_s28 = scalar_lea.hbm %s918_s23, 16  ;;  %s701_s5 = scalar_lea.hbm %s957_s2, 32 }
 0x4d7   : > { %p698_p5 = scmp.ne.s32.totalorder %s918_s23, %s697_s28  ;;  %p702_p1 = scmp.lt.s32.totalorder %s918_s23, %s957_s2 }
 0x4d8   : > { %p703_p4 = scmp.lt.s32.totalorder %s701_s5, %s697_s28 }
 0x4d9   : > { %p699_p9 = pnand %p698_p5, %p973_p3 }
 0x4da   : > { %p704_p6 = por %p703_p4, %p702_p1 }
 0x4db   : > { %p700_p12 = pneg %p699_p9 }
 0x4dd   : > { %p705_p8 = pnand %p704_p6, %p700_p12 }
 0x4df   : > { %708 = shalt.err (!%p705_p8)
}
 0x4e0   : > { %553 = dma.vmem_to_hbm [thread:$0]  (%p973_p3), %s441_s18, 16, %s918_s23, %s428_s24  }
 0x4e1 PF: > { %s452_s14 = sand.u32 1, %s739_s9   ;;  %p974_p11 = scmp.ne.s32.totalorder %s963_s16, 0 }
 0x4e2   : > { %p975_p7 = scmp.ge.s32.totalorder %s751_s12, 2  ;;  %s453_s22 = scalar_lea.sflag [#allocation4], %s452_s14 }
 0x4e4   : > { %p564_p10 = pnand %p975_p7, %p974_p11 }
 0x4e6   : > { %p565_p2 = pneg %p564_p10 }
 0x4e8   : > { %734 = dma.done.wait (%p565_p2), %s453_s22, 16  }
 0x4e9   : > { %736 = vsyncadd (%p565_p2), %s453_s22, 4294967280  ;;  %p16_p13 = scmp.ge.s32.totalorder %s834_s21, 4   ;;  %s976_s9 = smov %s743_s10 }
 0x4ea   : > { %s977_s10 = smov %s747_s11  ;;  %s978_s11 = smov %s851_s29 }
 0x4eb   : > { %s979_s12 = smov %s834_s21  ;;  %18 = sbr.rel (!%p16_p13) target bundleno = 6 (0x6), region = 77 }
 0x4f0   :  { %457 = vsyncpa [#allocation3], 1 }
 0x4f1   :  { %459 = vsyncpa [#allocation3 + $0x1], 1 }
 0x4f2   :  { %460 = vsyncpa [#allocation6], 1 }
 0x4f3   :  { %461 = vsyncpa [#allocation4], 1 }
 0x4f4   :  { %463 = vsyncpa [#allocation4 + $0x1], 1 }

</bundles_post_ra>
